<compile_context>
chip_gen: v5e
topology: v5e:2x2
jax: 0.10.0
libtpu: 0.0.40
codegen_flags: <defaults>
</compile_context>

<pallas_src>
import jax
import jax.numpy as jnp
from jax.experimental import pallas as pl
from jax.experimental.pallas import tpu as pltpu


def _round_up(a, b):
    return (a + b - 1) // b * b


def pooling_mlp_kernel(x_ref, w1_ref, b1_ref, w2_ref, b2_ref, o_ref, acc_ref):
    # Grid: axis 0 = batch tiles ("parallel"), axis 1 = H*W tiles ("arbitrary").
    k = pl.program_id(1)

    @pl.when(k == 0)
    def _init():
        acc_ref[...] = jnp.zeros_like(acc_ref)

    # Running spatial sum over this H*W tile (lane-axis reduce; DMA-bound regime).
    acc_ref[...] += jnp.sum(x_ref[...], axis=-1)          # (tile_n, C)

    @pl.when(k == pl.num_programs(1) - 1)
    def _epilogue():
        # acc holds the spatial SUM; the 1/(H*W) mean scale is folded into w1.
        pooled = acc_ref[...]                              # (tile_n, C)
        h = jnp.maximum(pooled, 0.0)                       # ReLU
        h = jnp.dot(h, w1_ref[...],
                    preferred_element_type=jnp.float32) + b1_ref[...]
        h = jnp.maximum(h, 0.0)                            # ReLU
        out = jnp.dot(h, w2_ref[...],
                      preferred_element_type=jnp.float32) + b2_ref[...]
        o_ref[...] = out.astype(o_ref.dtype)


def pooling_mlp(x_nchw, w1, b1, w2, b2, *, tile_n_target=128, tile_hw_target=2048):
    """x_nchw: (N, C, H, W) f32; w1: (C, hidden); w2: (hidden, out) -> (N, out)."""
    N, C, H, W = x_nchw.shape
    HW = H * W
    hidden = w1.shape[1]
    out_features = w2.shape[1]

    # Spatial tiling (lane axis, 128-aligned). Zero padding keeps the sum exact.
    tile_hw = min(_round_up(HW, 128), tile_hw_target)
    HW_pad = _round_up(HW, tile_hw)

    # Batch tiling: a single tile may be any size (block == full dim); multiple
    # tiles use an 8-aligned tile so the output BlockSpec stays legal.
    if N <= tile_n_target:
        tile_n, N_pad = N, N
    else:
        tile_n = tile_n_target
        N_pad = _round_up(N, tile_n)

    x3 = x_nchw.reshape(N, C, HW)
    if (N_pad, HW_pad) != (N, HW):
        # Zero padding: extra spatial columns add nothing to the sum; extra
        # batch rows produce garbage that is sliced off below.
        x3 = jnp.pad(x3, ((0, N_pad - N), (0, 0), (0, HW_pad - HW)))

    # Fold the 1/(H*W) mean scale into w1 (ReLU is positive-homogeneous).
    w1_scaled = (w1 * (1.0 / HW)).astype(jnp.float32)
    b1_2d = b1.reshape(1, hidden).astype(jnp.float32)
    w2_f = w2.astype(jnp.float32)
    b2_2d = b2.reshape(1, out_features).astype(jnp.float32)

    grid = (N_pad // tile_n, HW_pad // tile_hw)

    out_pad = pl.pallas_call(
        pooling_mlp_kernel,
        out_shape=jax.ShapeDtypeStruct((N_pad, out_features), jnp.float32),
        grid_spec=pltpu.PrefetchScalarGridSpec(
            num_scalar_prefetch=0,
            grid=grid,
            in_specs=[
                pl.BlockSpec((tile_n, C, tile_hw), lambda i, k: (i, 0, k)),
                pl.BlockSpec((C, hidden), lambda i, k: (0, 0)),
                pl.BlockSpec((1, hidden), lambda i, k: (0, 0)),
                pl.BlockSpec((hidden, out_features), lambda i, k: (0, 0)),
                pl.BlockSpec((1, out_features), lambda i, k: (0, 0)),
            ],
            out_specs=pl.BlockSpec((tile_n, out_features), lambda i, k: (i, 0)),
            scratch_shapes=[pltpu.VMEM((tile_n, C), jnp.float32)],
        ),
        compiler_params=pltpu.CompilerParams(
            dimension_semantics=("parallel", "arbitrary"),
            vmem_limit_bytes=32 * 1024 * 1024,
        ),
    )(x3, w1_scaled, b1_2d, w2_f, b2_2d)

    return out_pad[:N]


def reference(x_nchw, w1, b1, w2, b2):
    pooled = jnp.mean(x_nchw, axis=(2, 3))
    h = jnp.maximum(pooled, 0.0)
    h = h @ w1 + b1
    h = jnp.maximum(h, 0.0)
    return h @ w2 + b2


if __name__ == "__main__":
    # Module config: in_features=4, hidden_features=32, out_features=8,
    # num_layers=2, global_pool='fast', act='relu', has_norm=False, bias=True.
    # TODO(synk): kernel is specialized to num_layers=2 / ReLU / no LayerNorm.
    N, C, H, W = 2, 4, 16, 16
    hidden_features, out_features = 32, 8

    key = jax.random.PRNGKey(0)
    kx, kw1, kb1, kw2, kb2 = jax.random.split(key, 5)

    x = jax.random.normal(kx, (N, C, H, W), dtype=jnp.float32)

    # Deterministic synthetic parameters (Linear weights stored as (in, out)).
    w1 = jax.random.normal(kw1, (C, hidden_features), dtype=jnp.float32) * 0.1
    b1 = jax.random.normal(kb1, (hidden_features,), dtype=jnp.float32) * 0.1
    w2 = jax.random.normal(kw2, (hidden_features, out_features), dtype=jnp.float32) * 0.1
    b2 = jax.random.normal(kb2, (out_features,), dtype=jnp.float32) * 0.1

    out = pooling_mlp(x, w1, b1, w2, b2)
    out = jax.block_until_ready(out)

    ref = reference(x, w1, b1, w2, b2)
    assert out.shape == (N, out_features)
    assert jnp.allclose(out, ref, atol=1e-5, rtol=1e-5), "mismatch vs reference"

    print("KERNEL_OK")
</pallas_src>

<mosaic_0001>
module attributes {stable_mosaic.version = 11 : i64} {
  func.func @pooling_mlp_kernel(%arg0: i32, %arg1: i32, %arg2: memref<2x4x256xf32, #tpu.memory_space<vmem>>, %arg3: memref<4x32xf32, #tpu.memory_space<vmem>>, %arg4: memref<1x32xf32, #tpu.memory_space<vmem>>, %arg5: memref<32x8xf32, #tpu.memory_space<vmem>>, %arg6: memref<1x8xf32, #tpu.memory_space<vmem>>, %arg7: memref<2x8xf32, #tpu.memory_space<vmem>>, %arg8: memref<2x4xf32, #tpu.memory_space<vmem>>) attributes {dimension_semantics = [#tpu.dimension_semantics<parallel>, #tpu.dimension_semantics<arbitrary>], iteration_bounds = array<i64: 1, 1>, scalar_prefetch = 0 : i64, scratch_operands = 1 : i64, tpu.core_type = #tpu.core_type<tc>, window_params = [{transform_indices = @transform_0, window_bounds = array<i64: 2, 4, 256>}, {pipeline_mode = #tpu.pipeline_mode<synchronous>, transform_indices = @transform_1, window_bounds = array<i64: 4, 32>}, {pipeline_mode = #tpu.pipeline_mode<synchronous>, transform_indices = @transform_2, window_bounds = array<i64: 1, 32>}, {pipeline_mode = #tpu.pipeline_mode<synchronous>, transform_indices = @transform_3, window_bounds = array<i64: 32, 8>}, {pipeline_mode = #tpu.pipeline_mode<synchronous>, transform_indices = @transform_4, window_bounds = array<i64: 1, 8>}, {transform_indices = @transform_5, window_bounds = array<i64: 2, 8>}]} {
    %c0_i32 = arith.constant 0 : i32
    %0 = arith.cmpi eq, %arg1, %c0_i32 : i32
    %1 = arith.extui %0 : i1 to i32
    %c0_i32_0 = arith.constant 0 : i32
    %2 = arith.cmpi ne, %1, %c0_i32_0 : i32
    scf.if %2 {
      %cst_9 = arith.constant 0.000000e+00 : f32
      %11 = vector.broadcast %cst_9 : f32 to vector<2x4xf32>
      %c0_10 = arith.constant 0 : index
      %c0_11 = arith.constant 0 : index
      %12 = vector.load %arg8[%c0_10, %c0_11] : memref<2x4xf32, #tpu.memory_space<vmem>>, vector<2x4xf32>
      tpu.vector_store %arg8[%c0_10, %c0_11], %11 {strides = array<i32>} : memref<2x4xf32, #tpu.memory_space<vmem>>, vector<2x4xf32>,
    } else {
    }
    %c0 = arith.constant 0 : index
    %c0_1 = arith.constant 0 : index
    %3 = vector.load %arg8[%c0, %c0_1] : memref<2x4xf32, #tpu.memory_space<vmem>>, vector<2x4xf32>
    %c0_2 = arith.constant 0 : index
    %c0_3 = arith.constant 0 : index
    %c0_4 = arith.constant 0 : index
    %4 = vector.load %arg2[%c0_2, %c0_3, %c0_4] : memref<2x4x256xf32, #tpu.memory_space<vmem>>, vector<2x4x256xf32>
    %cst = arith.constant dense<0.000000e+00> : vector<2x4xf32>
    %5 = vector.multi_reduction <add>, %4, %cst [2] : vector<2x4x256xf32> to vector<2x4xf32>
    %6 = arith.addf %3, %5 : vector<2x4xf32>
    %c0_5 = arith.constant 0 : index
    %c0_6 = arith.constant 0 : index
    %7 = vector.load %arg8[%c0_5, %c0_6] : memref<2x4xf32, #tpu.memory_space<vmem>>, vector<2x4xf32>
    tpu.vector_store %arg8[%c0_5, %c0_6], %6 {strides = array<i32>} : memref<2x4xf32, #tpu.memory_space<vmem>>, vector<2x4xf32>,
    %c0_i32_7 = arith.constant 0 : i32
    %8 = arith.cmpi eq, %arg1, %c0_i32_7 : i32
    %9 = arith.extui %8 : i1 to i32
    %c0_i32_8 = arith.constant 0 : i32
    %10 = arith.cmpi ne, %9, %c0_i32_8 : i32
    scf.if %10 {
      %c0_9 = arith.constant 0 : index
      %c0_10 = arith.constant 0 : index
      %11 = vector.load %arg8[%c0_9, %c0_10] : memref<2x4xf32, #tpu.memory_space<vmem>>, vector<2x4xf32>
      %cst_11 = arith.constant 0.000000e+00 : f32
      %12 = vector.broadcast %cst_11 : f32 to vector<2x4xf32>
      %13 = arith.maximumf %11, %12 : vector<2x4xf32>
      %c0_12 = arith.constant 0 : index
      %c0_13 = arith.constant 0 : index
      %14 = vector.load %arg3[%c0_12, %c0_13] : memref<4x32xf32, #tpu.memory_space<vmem>>, vector<4x32xf32>
      %cst_14 = arith.constant dense<0.000000e+00> : vector<2x32xf32>
      %15 = tpu.matmul %13, %14, %cst_14 {dimension_numbers = #tpu.dot_dimension_numbers<[1], [0], [0], [1], [0, 0, 1, 1], [], []>} : vector<2x4xf32>, vector<4x32xf32>, vector<2x32xf32> -> vector<2x32xf32>
      %c0_15 = arith.constant 0 : index
      %c0_16 = arith.constant 0 : index
      %16 = vector.load %arg4[%c0_15, %c0_16] : memref<1x32xf32, #tpu.memory_space<vmem>>, vector<1x32xf32>
      %17 = vector.broadcast %16 : vector<1x32xf32> to vector<2x32xf32>
      %18 = arith.addf %15, %17 : vector<2x32xf32>
      %cst_17 = arith.constant 0.000000e+00 : f32
      %19 = vector.broadcast %cst_17 : f32 to vector<2x32xf32>
      %20 = arith.maximumf %18, %19 : vector<2x32xf32>
      %c0_18 = arith.constant 0 : index
      %c0_19 = arith.constant 0 : index
      %21 = vector.load %arg5[%c0_18, %c0_19] : memref<32x8xf32, #tpu.memory_space<vmem>>, vector<32x8xf32>
      %cst_20 = arith.constant dense<0.000000e+00> : vector<2x8xf32>
      %22 = tpu.matmul %20, %21, %cst_20 {dimension_numbers = #tpu.dot_dimension_numbers<[1], [0], [0], [1], [0, 0, 1, 1], [], []>} : vector<2x32xf32>, vector<32x8xf32>, vector<2x8xf32> -> vector<2x8xf32>
      %c0_21 = arith.constant 0 : index
      %c0_22 = arith.constant 0 : index
      %23 = vector.load %arg6[%c0_21, %c0_22] : memref<1x8xf32, #tpu.memory_space<vmem>>, vector<1x8xf32>
      %24 = vector.broadcast %23 : vector<1x8xf32> to vector<2x8xf32>
      %25 = arith.addf %22, %24 : vector<2x8xf32>
      %c0_23 = arith.constant 0 : index
      %c0_24 = arith.constant 0 : index
      %26 = vector.load %arg7[%c0_23, %c0_24] : memref<2x8xf32, #tpu.memory_space<vmem>>, vector<2x8xf32>
      tpu.vector_store %arg7[%c0_23, %c0_24], %25 {strides = array<i32>} : memref<2x8xf32, #tpu.memory_space<vmem>>, vector<2x8xf32>,
    } else {
    }
    return
  }
  func.func @transform_0(%arg0: i32, %arg1: i32) -> (i32, i32, i32) {
    %c0_i32 = arith.constant 0 : i32
    %c0_i32_0 = arith.constant 0 : i32
    return %arg0, %c0_i32, %arg1 : i32, i32, i32
  }
  func.func @transform_1(%arg0: i32, %arg1: i32) -> (i32, i32) {
    %c0_i32 = arith.constant 0 : i32
    %c0_i32_0 = arith.constant 0 : i32
    %c0_i32_1 = arith.constant 0 : i32
    return %c0_i32, %c0_i32_0 : i32, i32
  }
  func.func @transform_2(%arg0: i32, %arg1: i32) -> (i32, i32) {
    %c0_i32 = arith.constant 0 : i32
    %c0_i32_0 = arith.constant 0 : i32
    %c0_i32_1 = arith.constant 0 : i32
    return %c0_i32, %c0_i32_0 : i32, i32
  }
  func.func @transform_3(%arg0: i32, %arg1: i32) -> (i32, i32) {
    %c0_i32 = arith.constant 0 : i32
    %c0_i32_0 = arith.constant 0 : i32
    %c0_i32_1 = arith.constant 0 : i32
    return %c0_i32, %c0_i32_0 : i32, i32
  }
  func.func @transform_4(%arg0: i32, %arg1: i32) -> (i32, i32) {
    %c0_i32 = arith.constant 0 : i32
    %c0_i32_0 = arith.constant 0 : i32
    %c0_i32_1 = arith.constant 0 : i32
    return %c0_i32, %c0_i32_0 : i32, i32
  }
  func.func @transform_5(%arg0: i32, %arg1: i32) -> (i32, i32) {
    %c0_i32 = arith.constant 0 : i32
    %c0_i32_0 = arith.constant 0 : i32
    return %arg0, %c0_i32 : i32, i32
  }
}

</mosaic_0001>

<bundles_post_ra>
// kernel: tpu_custom_call.1
= control target key start
LH: loop header
LB: loop body
LE: loop exit
PB: predicated region body
PF: predicated region fallthrough
CT: control target
= control target key end

     0   :  { %s256_s0 = inlined_call_operand.vmem [shape: f32[2,4,256], index: 0, kind: input, shape index: {}]   ;;  %s257_s1 = inlined_call_operand.vmem [shape: f32[4,32], index: 1, kind: input, shape index: {}]   ;;  %s258_s2 = inlined_call_operand.vmem [shape: f32[1,32], index: 2, kind: input, shape index: {}]   ;;  %s259_s3 = inlined_call_operand.vmem [shape: f32[32,8], index: 3, kind: input, shape index: {}]   ;;  %s260_s4 = inlined_call_operand.vmem [shape: f32[1,8], index: 4, kind: input, shape index: {}]   ;;  %s261_s5 = inlined_call_operand.hbm [shape: f32[2,8], index: 5, kind: output, shape index: {}]  }
   0x1   :  { %v28_v0 = vld [vmem:[%s256_s0] sm:$0xff]  ;;  %v29_v1 = vld [vmem:[%s256_s0 + $0x8] sm:$0xff] }
   0x2   :  { %32 = vst [vmem:[#allocation1] ss:$2 sm:$0xff] %v28_v0 }
   0x3   :  { %10 = vsyncpa [#allocation4], 0  ;;  %36 = vst [vmem:[#allocation1 + $0x10] ss:$2 sm:$0xff] %v29_v1  ;;  %vm43_vm0 = vcmask 1043456   ;;  %vm25_vm1 = vcmask 25600   ;;  %v56_v16 = vlaneseq }
   0x4   :  { %v187_v12 = vmov 0.0   ;;  %v71_v13 = vld [vmem:[%s257_s1] sm:$0xf]  ;;  %v107_v14 = vld [vmem:[%s259_s3 + $0x18] sm:$0xff]  ;;  %vm60_vm2 = vcmask 1041409   ;;  %vm76_vm3 = vcmask 31744  }
   0x5   :  { %26 = vst.msk [vmem:[#allocation2] sm:$0x3] %vm25_vm1, %v187_v12  ;;  %154 = vmatpush.msk.msra.mxu0 %vm43_vm0, %v71_v13  ;;  %128 = vmatpush.msra.mxu1 %v107_v14  ;;  %v57_v17 = vand.u32 127, %v56_v16  ;;  %v106_v26 = vld [vmem:[%s259_s3 + $0x10] sm:$0xff]  ;;  %v105_v27 = vld [vmem:[%s259_s3 + $0x8] sm:$0xff]  ;;  %v104_v28 = vld [vmem:[%s259_s3] sm:$0xff] }
   0x6   :  { %v159_v29 = vld [vmem:[%s258_s2] ss:$0 sm:$0xff]  ;;  %vm112_vm4 = vcmask 261120   ;;  %s188_s9 = smov [#allocation3]   ;;  %s145_s3 = sshll.u32 %s261_s5, 4  ;;  %vm136_vm5 = vcmask 58368   ;;  %s146_s3 = int_to_ptr.hbm [resolvable:$true] %s145_s3 }
   0x7   :  { %129 = vmatpush.msra.mxu1 %v106_v26  ;;  %v160_v33 = vld [vmem:[%s260_s4] ss:$0 sm:$0xff]  ;;  %s143_s10 = sshll.u32 %s188_s9, 4  ;;  %s144_s10 = int_to_ptr.vmem [resolvable:$true] %s143_s10 }
   0x9   :  { %v33_v2 = vld.sshfl [vmem:[#allocation1] sm:$0xff pattern:$0x75316420]  ;;  %v34_v3 = vld.sshfl [vmem:[#allocation1 + $0x8] sm:$0xff pattern:$0x75316420]  ;;  %130 = vmatpush.msra.mxu1 %v105_v27 }
   0xa   :  { %v44_v4 = vsel %vm43_vm0, %v33_v2, 0.0  ;;  %v45_v5 = vsel %vm43_vm0, %v34_v3, 0.0  ;;  %v37_v7 = vld.sshfl [vmem:[#allocation1 + $0x10] sm:$0xff pattern:$0x75316420] }
   0xb   :  { %v46_v6 = vadd.f32 %v45_v5, %v44_v4  ;;  %v38_v8 = vld.sshfl [vmem:[#allocation1 + $0x18] sm:$0xff pattern:$0x75316420]  ;;  %v49_v9 = vsel %vm43_vm0, %v37_v7, 0.0  ;;  %131 = vmatpush.msra.mxu1 %v104_v28 }
   0xc   :  { %v50_v10 = vsel %vm43_vm0, %v38_v8, 0.0  ;;  %v27_v20 = vld [vmem:[#allocation2] sm:$0x3] }
   0xd   :  { %47 = vadd.xlane.f32.xlu0 %v46_v6  ;;  %v51_v11 = vadd.f32 %v50_v10, %v49_v9 }
  0x15   :  { %52 = vadd.xlane.f32.xlu0 %v51_v11 }
  0x80   :  { %v48_v15 = vpop.xlane.xlu0 %47 }
  0x81   :  { %v58_v19 = vperm.slane %v48_v15, %v57_v17 }
  0x88   :  { %v53_v18 = vpop.xlane.xlu0 %52 }
  0x89   :  { %v59_v21 = vperm.slane %v53_v18, %v57_v17 }
  0x8b   :  { %v61_v22 = vsel %vm60_vm2, %v59_v21, %v58_v19 }
  0x8c   :  { %v63_v23 = vadd.f32 %v61_v22, %v27_v20 }
  0x8e   :  { %65 = vst.msk [vmem:[#allocation2] sm:$0x3] %vm25_vm1, %v63_v23 }
  0x95   :  { %v69_v24 = vld [vmem:[#allocation2] sm:$0x3] }
  0x96   :  { %v70_v25 = vmax.f32 %v69_v24, 0.0 }
  0x98   :  { %155 = vmatmul.msk.f32.vlgmr.msra.gmra.mxu0 %vm76_vm3, %v70_v25 }
 0x115   :  { %v100_v30 = vpop.f32.mrf.mxu0 }
 0x116   :  { %v101_v31 = vadd.f32 %v159_v29, %v100_v30 }
 0x118   :  { %v103_v32 = vmax.f32 %v101_v31, 0.0 }
 0x11a   :  { %156 = vmatmul.msk.f32.vlgmr.msra.gmra.mxu1 %vm112_vm4, %v103_v32 }
 0x197   :  { %v133_v34 = vpop.f32.mrf.mxu1 }
 0x198   :  { %v134_v35 = vadd.f32 %v160_v33, %v133_v34 }
 0x19a   :  { %137 = vst.msk [vmem:[#allocation3] sm:$0x3] %vm136_vm5, %v134_v35 }
 0x19b   :  { %148 = dma.vmem_to_hbm [thread:$0]  %s144_s10, 32, %s146_s3, [#allocation4]  }
 0x19c   :  { %185 = dma.done.wait [#allocation4], 32  }
 0x19d   :  { %186 = vsyncadd [#allocation4], 4294967264 }
 0x19e   :  { %153 = vsyncpa [#allocation4], 1 }

</bundles_post_ra>
